<compile_context>
chip_gen: v5e
topology: v5e:2x2
jax: 0.10.0
libtpu: 0.0.40
codegen_flags: <defaults>
</compile_context>

<pallas_src>
import functools

import jax
import jax.numpy as jnp
from jax.experimental import pallas as pl
from jax.experimental.pallas import tpu as pltpu


def _round_up(x: int, m: int) -> int:
    return ((x + m - 1) // m) * m


def _vmem_capacity_bytes() -> int:
    try:
        info = pltpu.get_tpu_info()
        cap = int(getattr(info, "vmem_capacity_bytes", 0))
        if cap > 0:
            return cap
    except Exception:
        pass
    # Conservative fallback (v7x has the smallest VMEM: 64 MiB per core).
    return 64 * 1024 * 1024


def _choose_tiles(batch, input_dim, o_pad, degree, w_bytes, budget_bytes):
    """Pick (tb, to): batch tile and output tile, VMEM-budget aware."""
    tb_cap = min(_round_up(batch, 8), 1024)
    tb_cands = [tb_cap] + [t for t in (1024, 512, 256, 128, 64, 32, 16, 8)
                           if t < tb_cap]

    # Output-tile candidates: whole padded O first (keeps W fully resident and
    # the basis computed once per batch tile), then 256-multiples (MXU column
    # width on v6e/v7x) ordered by least extra padding, 128 as last resort.
    m256 = list(range(256, o_pad, 256))
    m256.sort(key=lambda t: (_round_up(o_pad, t) - o_pad, -t))
    to_cands = [o_pad] + m256
    if o_pad > 128:
        to_cands.append(128)

    def vmem_bytes(tb, to):
        # Double-buffered pipeline blocks (x, W, bias, out) ...
        blocks = 2 * (tb * input_dim * 4
                      + degree * input_dim * to * w_bytes
                      + to * 4
                      + tb * to * 4)
        # ... plus in-kernel temporaries: u / 2u / T_{d-1} / T_d / T_{d+1} /
        # matmul-dtype cast of T_d, and the f32 accumulator.
        temps = 6 * tb * input_dim * 4 + tb * to * 4
        return blocks + temps

    tb_floor = min(tb_cap, 256)
    for to in to_cands:
        for tb in tb_cands:
            if tb >= tb_floor and vmem_bytes(tb, to) <= budget_bytes:
                return tb, to
    # Fallback: smallest tiles (always compilable for sane layer sizes).
    return 8, to_cands[-1]


def _chebykan_kernel(x_ref, w_ref, b_ref, o_ref, *, degree, matmul_dtype):
    """One (output-tile, batch-tile) grid step.

    x_ref : (TB, I)            activations
    w_ref : (degree, I, TO)    coeffs for degrees 1..degree (matmul_dtype)
    b_ref : (1, TO)            degree-0 contribution (T0 == 1 -> bias), f32
    o_ref : (TB, TO)           output tile, f32
    """
    u = jnp.tanh(x_ref[...].astype(jnp.float32))              # (TB, I)
    two_u = u + u                                             # hoisted

    # Chebyshev recurrence: T1 = u, T_d = 2u*T_{d-1} - T_{d-2}.  Identical to
    # cos(d*arccos(u)) for |u| <= 1 (guaranteed by tanh); no transcendentals
    # beyond the single tanh, and each degree feeds the MXU directly.
    t_prev = jnp.ones_like(u)                                 # T0
    t_cur = u                                                 # T1
    acc = jnp.dot(t_cur.astype(matmul_dtype), w_ref[0],
                  preferred_element_type=jnp.float32)         # (TB, TO)
    for d in range(2, degree + 1):
        t_next = two_u * t_cur - t_prev
        t_prev, t_cur = t_cur, t_next
        acc = acc + jnp.dot(t_cur.astype(matmul_dtype), w_ref[d - 1],
                            preferred_element_type=jnp.float32)
    o_ref[...] = (acc + b_ref[...]).astype(o_ref.dtype)


def cheby_kan_forward(x, cheby_coeffs, *, matmul_dtype=jnp.float32):
    """x: (..., input_dim); cheby_coeffs: (input_dim, output_dim, degree+1).

    Returns (flat_batch, output_dim) float32, matching the PyTorch module.
    Set matmul_dtype=jnp.bfloat16 for ~2-4x MXU throughput and half the
    weight DMA bytes at large shapes (accumulation stays float32).
    """
    input_dim, output_dim, d1 = cheby_coeffs.shape
    degree = d1 - 1

    x2d = x.reshape(-1, input_dim)
    batch = x2d.shape[0]

    # (I, O, D+1) -> (D+1, I, O); the T0 == 1 term becomes a per-output bias.
    c = jnp.transpose(cheby_coeffs, (2, 0, 1)).astype(jnp.float32)
    bias = jnp.sum(c[0], axis=0, keepdims=True)               # (1, O), f32

    if degree == 0:
        return jnp.broadcast_to(bias, (batch, output_dim)).astype(jnp.float32)

    w = c[1:].astype(matmul_dtype)                # (degree, I, O), cast ONCE
    w_bytes = jnp.dtype(matmul_dtype).itemsize

    # Lane-dense output padding + VMEM-aware tile choice.
    o_pad = _round_up(output_dim, 128)
    vmem_cap = _vmem_capacity_bytes()
    budget_bytes = vmem_cap // 2                  # headroom for compiler temps
    vmem_limit = (vmem_cap * 3) // 4

    tb, to = _choose_tiles(batch, input_dim, o_pad, degree, w_bytes,
                           budget_bytes)
    o_final = _round_up(o_pad, to)

    if o_final != output_dim:
        pad = o_final - output_dim
        w = jnp.pad(w, ((0, 0), (0, 0), (0, pad)))
        bias = jnp.pad(bias, ((0, 0), (0, pad)))

    b_pad = _round_up(batch, tb)
    if b_pad != batch:
        x2d = jnp.pad(x2d, ((0, b_pad - batch), (0, 0)))

    num_j = o_final // to
    num_i = b_pad // tb

    kernel = functools.partial(_chebykan_kernel, degree=degree,
                               matmul_dtype=matmul_dtype)

    x_bytes = jnp.dtype(x2d.dtype).itemsize
    cost = pl.CostEstimate(
        flops=2 * b_pad * degree * input_dim * o_final,
        transcendentals=b_pad * input_dim * num_j,            # tanh per step
        bytes_accessed=(num_j * b_pad * input_dim * x_bytes
                        + degree * input_dim * o_final * w_bytes
                        + o_final * 4
                        + b_pad * o_final * 4),
    )

    y = pl.pallas_call(
        kernel,
        out_shape=jax.ShapeDtypeStruct((b_pad, o_final), jnp.float32),
        grid_spec=pltpu.PrefetchScalarGridSpec(
            num_scalar_prefetch=0,
            # Output-tile axis OUTER, batch-tile axis INNER: the W block index
            # is constant along the inner axis -> each W block is DMA'd once,
            # instead of re-streaming the whole weight matrix per batch tile.
            grid=(num_j, num_i),
            in_specs=[
                pl.BlockSpec((tb, input_dim), lambda j, i: (i, 0)),
                pl.BlockSpec((degree, input_dim, to), lambda j, i: (0, 0, j)),
                pl.BlockSpec((1, to), lambda j, i: (0, j)),
            ],
            out_specs=pl.BlockSpec((tb, to), lambda j, i: (i, j)),
        ),
        compiler_params=pltpu.CompilerParams(
            dimension_semantics=("parallel", "parallel"),
            vmem_limit_bytes=vmem_limit,
        ),
        cost_estimate=cost,
    )(x2d, w, bias)

    return y[:batch, :output_dim]


def cheby_kan_reference(x, cheby_coeffs):
    """Pure-JAX reference mirroring the PyTorch forward exactly."""
    input_dim, output_dim, d1 = cheby_coeffs.shape
    degree = d1 - 1
    x = x.reshape(-1, input_dim)
    x = jnp.tanh(x)
    x = jnp.broadcast_to(x[:, :, None], x.shape + (d1,))
    x = jnp.arccos(x)
    x = x * jnp.arange(0, degree + 1, dtype=x.dtype)
    x = jnp.cos(x)
    y = jnp.einsum("bid,iod->bo", x, cheby_coeffs)
    return y.reshape(-1, output_dim)


if __name__ == "__main__":
    def run_case(B, input_dim, output_dim, degree, key,
                 matmul_dtype=jnp.float32, atol=1e-5, rtol=1e-5):
        kx, kc = jax.random.split(key)
        std = 1.0 / (input_dim * (degree + 1))   # matches nn.init.normal_ std
        coeffs = std * jax.random.normal(
            kc, (input_dim, output_dim, degree + 1), dtype=jnp.float32)
        x = jax.random.normal(kx, (B, input_dim), dtype=jnp.float32)

        y = jax.block_until_ready(
            cheby_kan_forward(x, coeffs, matmul_dtype=matmul_dtype))
        y_ref = cheby_kan_reference(x, coeffs)
        assert y.shape == (B, output_dim)
        err = float(jnp.max(jnp.abs(y - y_ref)))
        assert jnp.allclose(y, y_ref, atol=atol, rtol=rtol), \
            f"mismatch, max err {err}"

    key = jax.random.PRNGKey(0)
    k1, k2, k3 = jax.random.split(key, 3)
    # Shapes consistent with the module: small flat batch, I=16, O=32, deg=5.
    run_case(B=8, input_dim=16, output_dim=32, degree=5, key=k1)
    # Exercises batch / output-dim padding paths (O=40 -> padded lane-dense).
    run_case(B=50, input_dim=8, output_dim=40, degree=4, key=k2)
    # bf16 MXU path (weights cast once in the wrapper); looser tolerance.
    run_case(B=64, input_dim=16, output_dim=32, degree=5, key=k3,
             matmul_dtype=jnp.bfloat16, atol=1e-2, rtol=1e-2)

    print("KERNEL_OK")
</pallas_src>

<mosaic_0001>
module attributes {stable_mosaic.version = 11 : i64} {
  func.func @_chebykan_kernel(%arg0: i32, %arg1: i32, %arg2: memref<8x16xf32, #tpu.memory_space<vmem>>, %arg3: memref<5x16x128xf32, #tpu.memory_space<vmem>>, %arg4: memref<1x128xf32, #tpu.memory_space<vmem>>, %arg5: memref<8x128xf32, #tpu.memory_space<vmem>>) attributes {dimension_semantics = [#tpu.dimension_semantics<parallel>, #tpu.dimension_semantics<parallel>], iteration_bounds = array<i64: 1, 1>, scalar_prefetch = 0 : i64, scratch_operands = 0 : i64, tpu.core_type = #tpu.core_type<tc>, window_params = [{transform_indices = @transform_0, window_bounds = array<i64: 8, 16>}, {transform_indices = @transform_1, window_bounds = array<i64: 5, 16, 128>}, {transform_indices = @transform_2, window_bounds = array<i64: 1, 128>}, {transform_indices = @transform_3, window_bounds = array<i64: 8, 128>}]} {
    %c0 = arith.constant 0 : index
    %c0_0 = arith.constant 0 : index
    %0 = vector.load %arg2[%c0, %c0_0] : memref<8x16xf32, #tpu.memory_space<vmem>>, vector<8x16xf32>
    %1 = math.tanh %0 : vector<8x16xf32>
    %2 = arith.addf %1, %1 : vector<8x16xf32>
    %cst = arith.constant 1.000000e+00 : f32
    %3 = vector.broadcast %cst : f32 to vector<8x16xf32>
    %c0_1 = arith.constant 0 : index
    %c0_2 = arith.constant 0 : index
    %c0_3 = arith.constant 0 : index
    %4 = vector.load %arg3[%c0_1, %c0_2, %c0_3] : memref<5x16x128xf32, #tpu.memory_space<vmem>>, vector<1x16x128xf32>
    %5 = vector.shape_cast %4 : vector<1x16x128xf32> to vector<16x128xf32>
    %cst_4 = arith.constant dense<0.000000e+00> : vector<8x128xf32>
    %6 = tpu.matmul %1, %5, %cst_4 {dimension_numbers = #tpu.dot_dimension_numbers<[1], [0], [0], [1], [0, 0, 1, 1], [], []>} : vector<8x16xf32>, vector<16x128xf32>, vector<8x128xf32> -> vector<8x128xf32>
    %7 = arith.mulf %2, %1 : vector<8x16xf32>
    %8 = arith.subf %7, %3 : vector<8x16xf32>
    %c1 = arith.constant 1 : index
    %c0_5 = arith.constant 0 : index
    %c0_6 = arith.constant 0 : index
    %9 = vector.load %arg3[%c1, %c0_5, %c0_6] : memref<5x16x128xf32, #tpu.memory_space<vmem>>, vector<1x16x128xf32>
    %10 = vector.shape_cast %9 : vector<1x16x128xf32> to vector<16x128xf32>
    %cst_7 = arith.constant dense<0.000000e+00> : vector<8x128xf32>
    %11 = tpu.matmul %8, %10, %cst_7 {dimension_numbers = #tpu.dot_dimension_numbers<[1], [0], [0], [1], [0, 0, 1, 1], [], []>} : vector<8x16xf32>, vector<16x128xf32>, vector<8x128xf32> -> vector<8x128xf32>
    %12 = arith.addf %6, %11 : vector<8x128xf32>
    %13 = arith.mulf %2, %8 : vector<8x16xf32>
    %14 = arith.subf %13, %1 : vector<8x16xf32>
    %c2 = arith.constant 2 : index
    %c0_8 = arith.constant 0 : index
    %c0_9 = arith.constant 0 : index
    %15 = vector.load %arg3[%c2, %c0_8, %c0_9] : memref<5x16x128xf32, #tpu.memory_space<vmem>>, vector<1x16x128xf32>
    %16 = vector.shape_cast %15 : vector<1x16x128xf32> to vector<16x128xf32>
    %cst_10 = arith.constant dense<0.000000e+00> : vector<8x128xf32>
    %17 = tpu.matmul %14, %16, %cst_10 {dimension_numbers = #tpu.dot_dimension_numbers<[1], [0], [0], [1], [0, 0, 1, 1], [], []>} : vector<8x16xf32>, vector<16x128xf32>, vector<8x128xf32> -> vector<8x128xf32>
    %18 = arith.addf %12, %17 : vector<8x128xf32>
    %19 = arith.mulf %2, %14 : vector<8x16xf32>
    %20 = arith.subf %19, %8 : vector<8x16xf32>
    %c3 = arith.constant 3 : index
    %c0_11 = arith.constant 0 : index
    %c0_12 = arith.constant 0 : index
    %21 = vector.load %arg3[%c3, %c0_11, %c0_12] : memref<5x16x128xf32, #tpu.memory_space<vmem>>, vector<1x16x128xf32>
    %22 = vector.shape_cast %21 : vector<1x16x128xf32> to vector<16x128xf32>
    %cst_13 = arith.constant dense<0.000000e+00> : vector<8x128xf32>
    %23 = tpu.matmul %20, %22, %cst_13 {dimension_numbers = #tpu.dot_dimension_numbers<[1], [0], [0], [1], [0, 0, 1, 1], [], []>} : vector<8x16xf32>, vector<16x128xf32>, vector<8x128xf32> -> vector<8x128xf32>
    %24 = arith.addf %18, %23 : vector<8x128xf32>
    %25 = arith.mulf %2, %20 : vector<8x16xf32>
    %26 = arith.subf %25, %14 : vector<8x16xf32>
    %c4 = arith.constant 4 : index
    %c0_14 = arith.constant 0 : index
    %c0_15 = arith.constant 0 : index
    %27 = vector.load %arg3[%c4, %c0_14, %c0_15] : memref<5x16x128xf32, #tpu.memory_space<vmem>>, vector<1x16x128xf32>
    %28 = vector.shape_cast %27 : vector<1x16x128xf32> to vector<16x128xf32>
    %cst_16 = arith.constant dense<0.000000e+00> : vector<8x128xf32>
    %29 = tpu.matmul %26, %28, %cst_16 {dimension_numbers = #tpu.dot_dimension_numbers<[1], [0], [0], [1], [0, 0, 1, 1], [], []>} : vector<8x16xf32>, vector<16x128xf32>, vector<8x128xf32> -> vector<8x128xf32>
    %30 = arith.addf %24, %29 : vector<8x128xf32>
    %c0_17 = arith.constant 0 : index
    %c0_18 = arith.constant 0 : index
    %31 = vector.load %arg4[%c0_17, %c0_18] : memref<1x128xf32, #tpu.memory_space<vmem>>, vector<1x128xf32>
    %32 = vector.broadcast %31 : vector<1x128xf32> to vector<8x128xf32>
    %33 = arith.addf %30, %32 : vector<8x128xf32>
    %c0_19 = arith.constant 0 : index
    %c0_20 = arith.constant 0 : index
    %34 = vector.load %arg5[%c0_19, %c0_20] : memref<8x128xf32, #tpu.memory_space<vmem>>, vector<8x128xf32>
    tpu.vector_store %arg5[%c0_19, %c0_20], %33 {strides = array<i32>} : memref<8x128xf32, #tpu.memory_space<vmem>>, vector<8x128xf32>,
    return
  }
  func.func @transform_0(%arg0: i32, %arg1: i32) -> (i32, i32) {
    %c0_i32 = arith.constant 0 : i32
    %c0_i32_0 = arith.constant 0 : i32
    return %arg1, %c0_i32 : i32, i32
  }
  func.func @transform_1(%arg0: i32, %arg1: i32) -> (i32, i32, i32) {
    %c0_i32 = arith.constant 0 : i32
    %c0_i32_0 = arith.constant 0 : i32
    %c0_i32_1 = arith.constant 0 : i32
    return %c0_i32, %c0_i32_0, %arg0 : i32, i32, i32
  }
  func.func @transform_2(%arg0: i32, %arg1: i32) -> (i32, i32) {
    %c0_i32 = arith.constant 0 : i32
    %c0_i32_0 = arith.constant 0 : i32
    return %c0_i32, %arg0 : i32, i32
  }
  func.func @transform_3(%arg0: i32, %arg1: i32) -> (i32, i32) {
    %c0_i32 = arith.constant 0 : i32
    return %arg1, %arg0 : i32, i32
  }
}

</mosaic_0001>

<bundles_post_ra>
// kernel: tpu_custom_call.1
= control target key start
LH: loop header
LB: loop body
LE: loop exit
PB: predicated region body
PF: predicated region fallthrough
CT: control target
= control target key end

     0   :  { %8 = vsyncpa [#allocation3], 0  ;;  %s342_s0 = inlined_call_operand.hbm [shape: f32[8,16], index: 0, kind: input, shape index: {}]   ;;  %s343_s1 = inlined_call_operand.hbm [shape: f32[5,16,128], index: 1, kind: input, shape index: {}]   ;;  %s344_s2 = inlined_call_operand.vmem [shape: f32[1,128], index: 2, kind: input, shape index: {}]   ;;  %s345_s3 = inlined_call_operand.hbm [shape: f32[8,128], index: 3, kind: output, shape index: {}]  }
   0x1   :  { %9 = vsyncpa [#allocation6], 0 }
   0x2   :  { %10 = vsyncpa [#allocation4], 0  ;;  %s16_s14 = sshll.u32 %s342_s0, 4  ;;  %s305_s15 = smov [#allocation2]   ;;  %s17_s14 = int_to_ptr.hbm [resolvable:$true] %s16_s14 }
   0x3   :  { %s18_s16 = sshll.u32 %s305_s15, 4  ;;  %s26_s19 = sshll.u32 %s343_s1, 4  ;;  %s19_s16 = int_to_ptr.vmem [resolvable:$true] %s18_s16  ;;  %s27_s19 = int_to_ptr.hbm [resolvable:$true] %s26_s19 }
   0x4   :  { %21 = dma.hbm_to_vmem [thread:$0]  %s17_s14, 128, %s19_s16, [#allocation3]  }
   0x5   :  { %s306_s20 = smov [#allocation5]   ;;  %s307_s22 = smov 128  }
   0x6   :  { %s28_s21 = sshll.u32 %s306_s20, 4  ;;  %s308_s23 = smov 8   ;;  %s29_s21 = int_to_ptr.vmem [resolvable:$true] %s28_s21 }
   0x7   :  { %34 = dma.hbm_to_vmem [thread:$0]  %s27_s19, 1280, %s29_s21, [#allocation6], %s307_s22, %s307_s22, %s308_s23  }
   0x8   :  { %299 = dma.done.wait [#allocation3], 128  }
   0x9   :  { %300 = vsyncadd [#allocation3], 4294967168 }
   0xa   :  { %301 = dma.done.wait [#allocation6], 1280  }
   0xb   :  { %302 = vsyncadd [#allocation6], 4294966016  ;;  %v106_v0 = vld [vmem:[#allocation5 + $0x28] sm:$0xff]  ;;  %v105_v1 = vld [vmem:[#allocation5 + $0x20] sm:$0xff]  ;;  %vm55_vm0 = vcmask 130048   ;;  %s309_s24 = smov [#allocation7]  }
   0xc   :  { %v45_v2 = vld [vmem:[#allocation2] sm:$0xff]  ;;  %124 = vmatpush.msra.mxu2 %v106_v0  ;;  %v49_v4 = vld [vmem:[#allocation5 + $0x8] sm:$0xff]  ;;  %v53_v6 = vld [vmem:[#allocation5 + $0x10] sm:$0xff]  ;;  %s200_s25 = sshll.u32 %s309_s24, 4  ;;  %s202_s28 = sshll.u32 %s345_s3, 4  ;;  %s201_s25 = int_to_ptr.vmem [resolvable:$true] %s200_s25  ;;  %s203_s28 = int_to_ptr.hbm [resolvable:$true] %s202_s28 }
   0xd   :  { %225 = vtanh.f32 %v45_v2  ;;  %v54_v3 = vld [vmem:[#allocation5 + $0x18] sm:$0xff]  ;;  %96 = vmatpush.msra.mxu1 %v49_v4  ;;  %v48_v7 = vld [vmem:[#allocation5] sm:$0xff]  ;;  %v134_v8 = vld [vmem:[#allocation5 + $0x30] sm:$0xff] }
   0xe   :  { %v135_v5 = vld [vmem:[#allocation5 + $0x38] sm:$0xff]  ;;  %73 = vmatpush.msra.mxu0 %v54_v3  ;;  %125 = vmatpush.msra.mxu2 %v105_v1  ;;  %v164_v9 = vld [vmem:[#allocation5 + $0x48] sm:$0xff]  ;;  %v163_v10 = vld [vmem:[#allocation5 + $0x40] sm:$0xff] }
   0xf   :  { %153 = vmatpush.msra.mxu3 %v135_v5  ;;  %97 = vmatpush.msra.mxu1 %v48_v7  ;;  %v224_v29 = vld [vmem:[%s344_s2] ss:$0 sm:$0xff] }
  0x10   :  { %74 = vmatpush.msra.mxu0 %v53_v6 }
  0x11   :  { %154 = vmatpush.msra.mxu3 %v134_v8 }
  0x12   :  { %182 = vmatpush.msrb.mxu0 %v164_v9 }
  0x13   :  { %v226_v11 = vpop.eup %225 }
  0x14   :  { %183 = vmatpush.msrb.mxu0 %v163_v10  ;;  %v47_v12 = vadd.f32 %v226_v11, %v226_v11  ;;  %215 = vmatmul.msk.f32.vlgmr.msra.gmra.mxu1 %vm55_vm0, %v226_v11 }
  0x16   :  { %v50_v13 = vmul.f32 %v226_v11, %v47_v12 }
  0x18   :  { %v213_v14 = vadd.f32 -1.0, %v50_v13 }
  0x1a   :  { %v102_v15 = vmul.f32 %v213_v14, %v47_v12  ;;  %214 = vmatmul.msk.f32.vlgmr.msra.gmra.mxu0 %vm55_vm0, %v213_v14 }
  0x1c   :  { %v103_v16 = vsub.f32 %v102_v15, %v226_v11 }
  0x1e   :  { %216 = vmatmul.msk.f32.vlgmr.msra.gmra.mxu2 %vm55_vm0, %v103_v16  ;;  %v131_v17 = vmul.f32 %v103_v16, %v47_v12 }
  0x20   :  { %v132_v18 = vsub.f32 %v131_v17, %v213_v14 }
  0x22   :  { %217 = vmatmul.msk.f32.vlgmr.msra.gmra.mxu3 %vm55_vm0, %v132_v18  ;;  %v160_v19 = vmul.f32 %v132_v18, %v47_v12 }
  0x24   :  { %v161_v20 = vsub.f32 %v160_v19, %v103_v16 }
  0x26   :  { %218 = vmatmul.msk.f32.vlgmr.msrb.gmra.mxu0 %vm55_vm0, %v161_v20 }
  0x91   :  { %v99_v22 = vpop.f32.mrf.mxu1 }
  0x97   :  { %v76_v21 = vpop.f32.mrf.mxu0 }
  0x98   :  { %v100_v23 = vadd.f32 %v99_v22, %v76_v21 }
  0xa1   :  { %v127_v24 = vpop.f32.mrf.mxu2 }
  0xa2   :  { %v130_v25 = vadd.f32 %v127_v24, %v100_v23 }
  0xa3   :  { %v185_v27 = vpop.f32.mrf.mxu0 }
  0xa5   :  { %v156_v26 = vpop.f32.mrf.mxu3 }
  0xa6   :  { %v159_v28 = vadd.f32 %v156_v26, %v130_v25 }
  0xa8   :  { %v188_v30 = vadd.f32 %v185_v27, %v159_v28 }
  0xaa   :  { %v193_v31 = vadd.f32 %v224_v29, %v188_v30 }
  0xac   :  { %194 = vst [vmem:[#allocation7] sm:$0xff] %v193_v31 }
  0xad   :  { %205 = dma.vmem_to_hbm [thread:$0]  %s201_s25, 128, %s203_s28, [#allocation4]  }
  0xae   :  { %303 = dma.done.wait [#allocation4], 128  }
  0xaf   :  { %304 = vsyncadd [#allocation4], 4294967168 }
  0xb0   :  { %210 = vsyncpa [#allocation3], 1 }
  0xb1   :  { %211 = vsyncpa [#allocation6], 1 }
  0xb2   :  { %212 = vsyncpa [#allocation4], 1 }

</bundles_post_ra>
